<compile_context>
chip_gen: v5e
topology: v5e:2x2
jax: 0.10.0
libtpu: 0.0.40
codegen_flags: <defaults>
</compile_context>

<pallas_src>
import jax
import jax.numpy as jnp
from jax.experimental import pallas as pl
from jax.experimental.pallas import tpu as pltpu


def _copy_kernel(x_ref, o_ref):
    # Pure identity copy of the current lane-dense tile.
    o_ref[...] = x_ref[...]


def _choose_lane_tile(per_row):
    """Pick the largest 128-multiple divisor of `per_row` that still yields
    >= 2 grid steps (so the grid can be sharded across TensorCores).  Falls
    back to the full row, which is always a legal block (equals full dim)."""
    if per_row % 128 != 0:
        return per_row
    for k in range(per_row // 128, 0, -1):
        t = 128 * k
        if per_row % t == 0 and per_row // t >= 2:
            return t
    return per_row


def image_view_forward(x, *, hidden_dim=16, channel=3):
    """Equivalent of ImageViewLayer.forward: x.view(-1, channel, H, H)."""
    per_img = channel * hidden_dim * hidden_dim
    total = x.size
    assert total % per_img == 0, (total, per_img)
    batch = total // per_img

    # Contiguous row-major flatten (metadata only, same contract as torch.view).
    flat = x.reshape(batch, per_img)

    lane_tile = _choose_lane_tile(per_img)
    n_tiles = per_img // lane_tile

    y = pl.pallas_call(
        _copy_kernel,
        out_shape=jax.ShapeDtypeStruct((batch, per_img), x.dtype),
        grid_spec=pltpu.PrefetchScalarGridSpec(
            num_scalar_prefetch=0,
            grid=(n_tiles,),
            # Lane-dense blocks: minor dim is a multiple of 128 (or the full
            # row); second-minor dim equals the full array dim -> always legal.
            in_specs=[pl.BlockSpec((batch, lane_tile), lambda j: (0, j))],
            out_specs=pl.BlockSpec((batch, lane_tile), lambda j: (0, j)),
        ),
        compiler_params=pltpu.CompilerParams(
            dimension_semantics=("parallel",)),
    )(flat)

    # Final shape reinterpretation of contiguous data: zero-cost.
    return y.reshape(batch, channel, hidden_dim, hidden_dim)


if __name__ == "__main__":
    key = jax.random.PRNGKey(0)

    # Module config: ImageViewLayer(hidden_dim=16, channel=3)
    B, C, HD = 2, 3, 16
    x = jax.random.normal(key, (B, C * HD * HD), dtype=jnp.float32)

    out = image_view_forward(x, hidden_dim=HD, channel=C)
    out = jax.block_until_ready(out)

    ref = x.reshape(-1, C, HD, HD)
    assert out.shape == (B, C, HD, HD), out.shape
    assert jnp.array_equal(out, ref), float(jnp.max(jnp.abs(out - ref)))

    # .view flattens whatever leading layout it is given; check another shape.
    x2 = x.reshape(B * C * HD // 8, 8, HD)
    out2 = jax.block_until_ready(image_view_forward(x2, hidden_dim=HD, channel=C))
    assert jnp.array_equal(out2, ref)

    print("KERNEL_OK")
</pallas_src>

<mosaic_0001>
module attributes {stable_mosaic.version = 11 : i64} {
  func.func @_copy_kernel(%arg0: i32, %arg1: memref<2x384xf32, #tpu.memory_space<vmem>>, %arg2: memref<2x384xf32, #tpu.memory_space<vmem>>) attributes {dimension_semantics = [#tpu.dimension_semantics<parallel>], iteration_bounds = array<i64: 2>, scalar_prefetch = 0 : i64, scratch_operands = 0 : i64, tpu.core_type = #tpu.core_type<tc>, window_params = [{transform_indices = @transform_0, window_bounds = array<i64: 2, 384>}, {transform_indices = @transform_1, window_bounds = array<i64: 2, 384>}]} {
    %c0 = arith.constant 0 : index
    %c0_0 = arith.constant 0 : index
    %0 = vector.load %arg1[%c0, %c0_0] : memref<2x384xf32, #tpu.memory_space<vmem>>, vector<2x384xf32>
    %c0_1 = arith.constant 0 : index
    %c0_2 = arith.constant 0 : index
    %1 = vector.load %arg2[%c0_1, %c0_2] : memref<2x384xf32, #tpu.memory_space<vmem>>, vector<2x384xf32>
    tpu.vector_store %arg2[%c0_1, %c0_2], %0 {strides = array<i32>} : memref<2x384xf32, #tpu.memory_space<vmem>>, vector<2x384xf32>,
    return
  }
  func.func @transform_0(%arg0: i32) -> (i32, i32) {
    %c0_i32 = arith.constant 0 : i32
    %c0_i32_0 = arith.constant 0 : i32
    return %c0_i32, %arg0 : i32, i32
  }
  func.func @transform_1(%arg0: i32) -> (i32, i32) {
    %c0_i32 = arith.constant 0 : i32
    %c0_i32_0 = arith.constant 0 : i32
    return %c0_i32, %arg0 : i32, i32
  }
}

</mosaic_0001>

<bundles_post_ra>
// kernel: tpu_custom_call.1
= control target key start
LH: loop header
LB: loop body
LE: loop exit
PB: predicated region body
PF: predicated region fallthrough
CT: control target
= control target key end

     0   :  { %6 = vsyncpa [#allocation3], 0  ;;  %s509_s0 = inlined_call_operand.hbm [shape: f32[2,768], index: 0, kind: input, shape index: {}]   ;;  %s510_s1 = inlined_call_operand.hbm [shape: f32[2,768], index: 1, kind: output, shape index: {}]  }
   0x1   :  { %8 = vsyncpa [#allocation3 + $0x1], 0 }
   0x2   :  { %9 = vsyncpa [#allocation4], 0 }
   0x3   :  { %11 = vsyncpa [#allocation4 + $0x1], 0  ;;  %s392_s6 = smov 0   ;;  %s394_s7 = smov 0  }
   0x4   :  { %s396_s8 = smov 0   ;;  %s398_s9 = smov 0  }
   0x5 LB: > { %s413_s10 = sadd.s32 4294967295, %s380_s9   ;;  %s226_s11 = sadd.s32 4294967294, %s380_s9   ;;  %s380_s9 = sphi %s398_s9, %s518_s9   ;;  %s376_s8 = sphi %s396_s8, %s517_s8   ;;  %s372_s7 = sphi %s394_s7, %s516_s7   ;;  %s368_s6 = sphi %s392_s6, %s515_s6  }
   0x6   : > { %s417_s12 = sadd.s32 1, %s380_s9   ;;  %s24_s13 = sadd.s32 1, %s376_s8 }
   0x7   : > { %s21_s14 = ssub.s32 %s380_s9, %s417_s12  ;;  %p31_p0 = scmp.ne.s32.totalorder %s376_s8, %s372_s7 }
   0x8   : > { %p22_p1 = scmp.eq.s32.totalorder %s21_s14, 0  ;;  %p32_p2 = scmp.eq.s32.totalorder %s380_s9, 0 }
   0x9   : > { %p37_p3 = scmp.ne.s32.totalorder %s372_s7, %s368_s6  ;;  %p38_p4 = scmp.eq.s32.totalorder %s413_s10, 0 }
   0xa   : > { %s429_s15 = scalar_select %p22_p1, %s376_s8, %s24_s13  }
   0xb   : > { %p33_p5 = por %p32_p2, %p31_p0  ;;  %p431_p6 = por %p38_p4, %p37_p3 }
   0xc   : > { %p61_p7 = scmp.eq.s32.totalorder %s413_s10, 1  ;;  %p67_p8 = scmp.eq.s32.totalorder %s226_s11, 1 }
   0xd   : > { %p228_p9 = scmp.ge.s32.totalorder %s380_s9, 2  ;;  %p250_p10 = scmp.lt.s32.totalorder %s380_s9, 2 }
   0xe   : > { %p438_p11 = por %p61_p7, %p31_p0  ;;  %p442_p12 = por %p67_p8, %p37_p3 }
   0xf   : > { %s87_s19 = sand.u32 1, %s376_s8   ;;  %s234_s20 = smul.u32 6, %s380_s9 }
  0x10   : > { %s236_s21 = smul.u32 6, %s87_s19  ;;  %p451_p13 = pnand %p250_p10, %p33_p5 }
  0x11   : > { %s96_s24 = scalar_lea.hbm %s509_s0, %s234_s20  ;;  %s88_s29 = scalar_lea.sflag [#allocation3], %s87_s19 }
  0x12   : > { %s98_s26 = sshll.u32 %s96_s24, 4  ;;  %s91_s27 = scalar_lea.vmem [#allocation2], %s236_s21  ;;  %s99_s26 = int_to_ptr.hbm [resolvable:$true] %s98_s26 }
  0x13   : > { %s100_s28 = sshll.u32 %s91_s27, 4  ;;  %s284_s30 = sshra.s32 %s99_s26, 4  ;;  %s101_s28 = int_to_ptr.vmem [resolvable:$true] %s100_s28  ;;  %s285_s30 = int_to_ptr.hbm [resolvable:$true] %s284_s30 }
  0x14   : > { %s286_s2 = scalar_lea.hbm %s285_s30, 6  ;;  %p288_p1 = pneg %p451_p13 }
  0x15   : > { %p287_p0 = scmp.ne.s32.totalorder %s285_s30, %s286_s2  ;;  %s291_s5 = scalar_lea.hbm %s509_s0, 12 }
  0x16   : > { %p292_p4 = scmp.lt.s32.totalorder %s285_s30, %s509_s0  ;;  %p293_p5 = scmp.lt.s32.totalorder %s291_s5, %s286_s2 }
  0x17   : > { %p289_p2 = pnand %p288_p1, %p287_p0 }
  0x18   : > { %p294_p7 = por %p293_p5, %p292_p4 }
  0x19   : > { %p290_p3 = pneg %p289_p2 }
  0x1b   : > { %p295_p8 = pnand %p294_p7, %p290_p3 }
  0x1d   : > { %298 = shalt.err (!%p295_p8)
}
  0x1e   : > { %245 = dma.hbm_to_vmem [thread:$0]  (!%p451_p13), %s99_s26, 96, %s101_s28, %s88_s29  }
  0x1f   : > { %p230_p10 = scmp.ge.s32.totalorder %s380_s9, 1  ;;  %p105_p0 = scmp.lt.s32.totalorder %s380_s9, 3 }
  0x21   : > { %p106_p1 = pnand %p230_p10, %p105_p0 }
  0x22   : > { %s468_s14 = sand.u32 (!%p106_p1), 1, %s372_s7  }
  0x23   : > { %109 = sbr.rel (%p106_p1) target bundleno = 57 (0x39), region = 24  ;;  %s112_s20 = scalar_lea.sflag (!%p106_p1), [#allocation3], %s468_s14 }
  0x24   : > { %s237_s19 = smul.u32 (!%p106_p1), 6, %s468_s14 }
  0x26   : > { %s115_s21 = scalar_lea.vmem (!%p106_p1), [#allocation2], %s237_s19 }
  0x28   : > { %359 = dma.done.wait (%p431_p6), %s112_s20, 96  }
  0x29   : > { %361 = vsyncadd (%p431_p6), %s112_s20, 4294967200  ;;  %s235_s22 = smul.u32 6, %s413_s10  ;;  %s134_s23 = scalar_lea.vmem [#allocation5], %s237_s19  ;;  %v137_v0 = vld [vmem:[%s115_s21] sm:$0x3f] }
  0x2a   : > { %s153_s24 = sshll.u32 %s134_s23, 4  ;;  %138 = vst [vmem:[%s134_s23] sm:$0x3f] %v137_v0  ;;  %s140_s29 = scalar_lea.sflag [#allocation4], %s468_s14  ;;  %s154_s24 = int_to_ptr.vmem [resolvable:$true] %s153_s24 }
  0x2b   : > { %s151_s27 = scalar_lea.hbm %s510_s1, %s235_s22  ;;  %s334_s3 = scalar_lea.hbm %s510_s1, 12 }
  0x2c   : > { %s155_s28 = sshll.u32 %s151_s27, 4  ;;  %s156_s28 = int_to_ptr.hbm [resolvable:$true] %s155_s28 }
  0x2d   : > { %s328_s30 = sshra.s32 %s156_s28, 4  ;;  %s329_s30 = int_to_ptr.hbm [resolvable:$true] %s328_s30 }
  0x2e   : > { %s330_s16 = scalar_lea.hbm %s329_s30, 6  ;;  %p335_p3 = scmp.lt.s32.totalorder %s329_s30, %s510_s1 }
  0x2f   : > { %p331_p6 = scmp.ne.s32.totalorder %s329_s30, %s330_s16  ;;  %p336_p4 = scmp.lt.s32.totalorder %s334_s3, %s330_s16 }
  0x31   : > { %p332_p13 = pnand %p331_p6, %p438_p11  ;;  %p337_p5 = por %p336_p4, %p335_p3 }
  0x33   : > { %p333_p2 = pneg %p332_p13 }
  0x35   : > { %p338_p7 = pnand %p337_p5, %p333_p2 }
  0x37   : > { %341 = shalt.err (!%p338_p7)
}
  0x38   : > { %240 = dma.vmem_to_hbm [thread:$0]  (%p438_p11), %s154_s24, 96, %s156_s28, %s140_s29  }
  0x39 PF: > { %s167_s11 = sand.u32 1, %s368_s6   ;;  %p247_p8 = pnand %p228_p9, %p442_p12 }
  0x3a   : > { %s168_s13 = scalar_lea.sflag [#allocation4], %s167_s11 }
  0x3b   : > { %p248_p10 = pneg %p247_p8 }
  0x3d   : > { %363 = dma.done.wait (%p248_p10), %s168_s13, 96  }
  0x3e   : > { %365 = vsyncadd (%p248_p10), %s168_s13, 4294967200  ;;  %p14_p0 = scmp.ge.s32.totalorder %s417_s12, 4   ;;  %s515_s6 = smov %s372_s7 }
  0x3f   : > { %s516_s7 = smov %s376_s8  ;;  %s517_s8 = smov %s429_s15 }
  0x40   : > { %s518_s9 = smov %s417_s12  ;;  %16 = sbr.rel (!%p14_p0) target bundleno = 5 (0x5), region = 69 }
  0x45   :  { %174 = vsyncpa [#allocation3], 1 }
  0x46   :  { %176 = vsyncpa [#allocation3 + $0x1], 1 }
  0x47   :  { %177 = vsyncpa [#allocation4], 1 }
  0x48   :  { %179 = vsyncpa [#allocation4 + $0x1], 1 }

</bundles_post_ra>
